<compile_context>
chip_gen: v6e
topology: v6e:2x2x1
jax: 0.10.0
libtpu: 0.0.40
codegen_flags: <defaults>
</compile_context>

<pallas_src>
import functools

import jax
import jax.numpy as jnp
from jax.experimental import pallas as pl
from jax.experimental.pallas import tpu as pltpu

# small shapes consistent with the module's usage
BATCH = 2
CHANNELS = 4
HEIGHT = 16
WIDTH = 16
EPS = 1e-5


# --------------------------------- kernels ---------------------------------

def _norm_body(x_ref, gb_ref, o_ref, *, group_size, group_stride, eps, inv_n):
    """Row-wise normalization over the lane axis of a (rows, N) slab.

    group_size  : number of rows whose partial stats are combined (B for
                  batchnorm, 1 for instancenorm).
    group_stride: sublane distance between same-group rows (C for batchnorm).
    """
    x = x_ref[...].astype(jnp.float32)
    # Both reductions issued up front: one pass over the slab, both on the XLU.
    s = jnp.sum(x, axis=-1, keepdims=True)          # (rows, 1)
    q = jnp.sum(x * x, axis=-1, keepdims=True)      # (rows, 1)
    if group_size > 1:
        # BatchNorm: rows of the same channel sit `group_stride` sublanes apart
        # (rows are (b, c) flattened b-major).  Rotating the per-row partials by
        # k*group_stride and summing gives every row its channel's total without
        # any transpose / relayout.
        s_tot, q_tot = s, q
        for k in range(1, group_size):
            s_tot = s_tot + pltpu.roll(s, shift=k * group_stride, axis=0)
            q_tot = q_tot + pltpu.roll(q, shift=k * group_stride, axis=0)
        s, q = s_tot, q_tot
    mean = s * inv_n
    var = q * inv_n - mean * mean                   # single-pass variance (f32)
    scale = jax.lax.rsqrt(var + eps)                # EUP
    if gb_ref is not None:
        gb = gb_ref[...].astype(jnp.float32)        # (rows, 2) = [gamma | beta]
        scale = scale * gb[:, 0:1]
        shift = gb[:, 1:2] - mean * scale
    else:
        shift = -(mean * scale)
    # Single fused full-slab VPU pass: out = x*scale + shift.
    o_ref[...] = (x * scale + shift).astype(o_ref.dtype)


def _instance_norm_kernel(x_ref, o_ref, *, eps, inv_n):
    # No affine params for nn.InstanceNorm2d (affine=False by default):
    # no gamma/beta DMAs, no dead multiplies/adds.
    _norm_body(x_ref, None, o_ref, group_size=1, group_stride=1,
               eps=eps, inv_n=inv_n)


def _batch_norm_kernel(x_ref, gb_ref, o_ref, *, group_size, group_stride, eps, inv_n):
    _norm_body(x_ref, gb_ref, o_ref, group_size=group_size,
               group_stride=group_stride, eps=eps, inv_n=inv_n)


# --------------------------------- wrappers ---------------------------------

def _pick_row_block(num_rows, num_cols, itemsize):
    """Largest row block (multiple of 8 sublanes) with a <=~2 MiB tile so that
    double-buffered in+out tiles (~8 MiB) fit the 16 MiB v5e scoped-VMEM default."""
    tile_bytes = 2 * 1024 * 1024
    rows = max(8, (tile_bytes // max(num_cols * itemsize, 1)) // 8 * 8)
    return num_rows if num_rows <= rows else rows


def norm_layer_forward(x, norm_type, gamma=None, beta=None, eps=EPS):
    """Forward pass of NormLayer for a (B, C, H, W) input."""
    B, C, H, W = x.shape
    if norm_type == "none":
        # NoNorm: identity — no kernel launch, no fixed-cost overhead.
        return x

    R, N = B * C, H * W
    x2d = x.reshape(R, N)  # zero-copy reshape: no transpose, lane-dense last dim

    if norm_type == "instancenorm":
        tr = _pick_row_block(R, N, x2d.dtype.itemsize)
        kernel = functools.partial(_instance_norm_kernel, eps=eps, inv_n=1.0 / N)
        y2d = pl.pallas_call(
            kernel,
            out_shape=jax.ShapeDtypeStruct((R, N), x.dtype),
            grid=(pl.cdiv(R, tr),),
            in_specs=[pl.BlockSpec((tr, N), lambda i: (i, 0))],
            out_specs=pl.BlockSpec((tr, N), lambda i: (i, 0)),
            compiler_params=pltpu.CompilerParams(
                dimension_semantics=("parallel",)),
        )(x2d)
        return y2d.reshape(B, C, H, W)

    if norm_type == "batchnorm":
        g = gamma if gamma is not None else jnp.ones((C,), x.dtype)
        b = beta if beta is not None else jnp.zeros((C,), x.dtype)
        # One stacked affine input: row r (= b*C + c) carries (gamma[c], beta[c]).
        gb = jnp.tile(jnp.stack([g, b], axis=-1), (B, 1))  # (R, 2), tiny
        kernel = functools.partial(
            _batch_norm_kernel, group_size=B, group_stride=C,
            eps=eps, inv_n=1.0 / (B * N))
        vmem = pl.BlockSpec(memory_space=pltpu.MemorySpace.VMEM)
        # TODO(synk): for production-scale slabs that exceed scoped VMEM, batchnorm
        # needs a two-pass / lane-axis-grid accumulator scheme; the whole-slab
        # gridless call here is sized for the small shapes this module uses.
        y2d = pl.pallas_call(
            kernel,
            out_shape=jax.ShapeDtypeStruct((R, N), x.dtype),
            in_specs=[vmem, vmem],
            out_specs=vmem,
        )(x2d, gb)
        return y2d.reshape(B, C, H, W)

    raise ValueError(
        "Please specify a norm type from the set {batchnorm, instancenorm, none}")


# ----------------------- pure-JAX references (mirror PyTorch) -----------------------

def _reference_forward(x, norm_type, gamma=None, beta=None, eps=EPS):
    if norm_type == "none":
        return x
    if norm_type == "batchnorm":
        mean = jnp.mean(x, axis=(0, 2, 3), keepdims=True)
        var = jnp.var(x, axis=(0, 2, 3), keepdims=True)  # biased, as used for normalization
        xhat = (x - mean) / jnp.sqrt(var + eps)
        g = gamma.reshape(1, -1, 1, 1) if gamma is not None else 1.0
        b = beta.reshape(1, -1, 1, 1) if beta is not None else 0.0
        return xhat * g + b
    if norm_type == "instancenorm":
        mean = jnp.mean(x, axis=(2, 3), keepdims=True)
        var = jnp.var(x, axis=(2, 3), keepdims=True)
        return (x - mean) / jnp.sqrt(var + eps)
    raise ValueError(norm_type)


if __name__ == "__main__":
    key = jax.random.PRNGKey(0)
    k_x, k_g, k_b = jax.random.split(key, 3)

    x = jax.random.normal(k_x, (BATCH, CHANNELS, HEIGHT, WIDTH), jnp.float32)
    # BatchNorm2d affine params (default init is gamma=1, beta=0; random here so
    # the affine path is actually exercised).
    gamma = 1.0 + 0.1 * jax.random.normal(k_g, (CHANNELS,), jnp.float32)
    beta = 0.1 * jax.random.normal(k_b, (CHANNELS,), jnp.float32)

    # --- batchnorm ---
    y_bn = norm_layer_forward(x, "batchnorm", gamma=gamma, beta=beta)
    jax.block_until_ready(y_bn)
    y_bn_ref = _reference_forward(x, "batchnorm", gamma=gamma, beta=beta)
    assert jnp.allclose(y_bn, y_bn_ref, atol=2e-5, rtol=2e-5), "batchnorm mismatch"

    # --- instancenorm ---
    y_in = norm_layer_forward(x, "instancenorm")
    jax.block_until_ready(y_in)
    y_in_ref = _reference_forward(x, "instancenorm")
    assert jnp.allclose(y_in, y_in_ref, atol=2e-5, rtol=2e-5), "instancenorm mismatch"

    # --- none ---
    y_none = norm_layer_forward(x, "none")
    jax.block_until_ready(y_none)
    assert jnp.allclose(y_none, x), "none (identity) mismatch"

    # TODO(synk): BatchNorm2d running_mean/running_var tracking (eval-mode stats)
    # is stateful bookkeeping outside the forward math and is not implemented;
    # the kernel reproduces the training-mode normalization output.

    print("KERNEL_OK")
</pallas_src>

<mosaic_0001>
module attributes {stable_mosaic.version = 11 : i64} {
  func.func @_batch_norm_kernel(%arg0: memref<8x256xf32, #tpu.memory_space<vmem>>, %arg1: memref<8x2xf32, #tpu.memory_space<vmem>>, %arg2: memref<8x256xf32, #tpu.memory_space<vmem>>) attributes {dimension_semantics = [], scalar_prefetch = 0 : i64, scratch_operands = 0 : i64, tpu.core_type = #tpu.core_type<tc>} {
    %c0 = arith.constant 0 : index
    %c0_0 = arith.constant 0 : index
    %0 = vector.load %arg0[%c0, %c0_0] : memref<8x256xf32, #tpu.memory_space<vmem>>, vector<8x256xf32>
    %cst = arith.constant dense<0.000000e+00> : vector<8xf32>
    %1 = vector.multi_reduction <add>, %0, %cst [1] : vector<8x256xf32> to vector<8xf32>
    %2 = vector.shape_cast %1 : vector<8xf32> to vector<8x1xf32>
    %3 = arith.mulf %0, %0 : vector<8x256xf32>
    %cst_1 = arith.constant dense<0.000000e+00> : vector<8xf32>
    %4 = vector.multi_reduction <add>, %3, %cst_1 [1] : vector<8x256xf32> to vector<8xf32>
    %5 = vector.shape_cast %4 : vector<8xf32> to vector<8x1xf32>
    %c4_i32 = arith.constant 4 : i32
    %6 = tpu.dynamic_rotate %2 by %c4_i32 dim 0 : vector<8x1xf32>, i32 -> vector<8x1xf32>
    %7 = arith.addf %2, %6 : vector<8x1xf32>
    %c4_i32_2 = arith.constant 4 : i32
    %8 = tpu.dynamic_rotate %5 by %c4_i32_2 dim 0 : vector<8x1xf32>, i32 -> vector<8x1xf32>
    %9 = arith.addf %5, %8 : vector<8x1xf32>
    %cst_3 = arith.constant 0.001953125 : f32
    %10 = vector.broadcast %cst_3 : f32 to vector<8x1xf32>
    %11 = arith.mulf %7, %10 : vector<8x1xf32>
    %cst_4 = arith.constant 0.001953125 : f32
    %12 = vector.broadcast %cst_4 : f32 to vector<8x1xf32>
    %13 = arith.mulf %9, %12 : vector<8x1xf32>
    %14 = arith.mulf %11, %11 : vector<8x1xf32>
    %15 = arith.subf %13, %14 : vector<8x1xf32>
    %cst_5 = arith.constant 9.99999974E-6 : f32
    %16 = vector.broadcast %cst_5 : f32 to vector<8x1xf32>
    %17 = arith.addf %15, %16 : vector<8x1xf32>
    %18 = math.rsqrt %17 : vector<8x1xf32>
    %c0_6 = arith.constant 0 : index
    %c0_7 = arith.constant 0 : index
    %19 = vector.load %arg1[%c0_6, %c0_7] : memref<8x2xf32, #tpu.memory_space<vmem>>, vector<8x2xf32>
    %20 = vector.extract_strided_slice %19 {offsets = [0, 0], sizes = [8, 1], strides = [1, 1]} : vector<8x2xf32> to vector<8x1xf32>
    %21 = arith.mulf %18, %20 : vector<8x1xf32>
    %22 = vector.extract_strided_slice %19 {offsets = [0, 1], sizes = [8, 1], strides = [1, 1]} : vector<8x2xf32> to vector<8x1xf32>
    %23 = arith.mulf %11, %21 : vector<8x1xf32>
    %24 = arith.subf %22, %23 : vector<8x1xf32>
    %25 = vector.broadcast %21 : vector<8x1xf32> to vector<8x256xf32>
    %26 = arith.mulf %0, %25 : vector<8x256xf32>
    %27 = vector.broadcast %24 : vector<8x1xf32> to vector<8x256xf32>
    %28 = arith.addf %26, %27 : vector<8x256xf32>
    %c0_8 = arith.constant 0 : index
    %c0_9 = arith.constant 0 : index
    %29 = vector.load %arg2[%c0_8, %c0_9] : memref<8x256xf32, #tpu.memory_space<vmem>>, vector<8x256xf32>
    tpu.vector_store %arg2[%c0_8, %c0_9], %28 {strides = array<i32>} : memref<8x256xf32, #tpu.memory_space<vmem>>, vector<8x256xf32>,
    return
  }
}

</mosaic_0001>

<bundles_post_ra>
// kernel: tpu_custom_call.1
= control target key start
LH: loop header
LB: loop body
LE: loop exit
PB: predicated region body
PF: predicated region fallthrough
CT: control target
= control target key end

     0   :  { %7 = vsyncpa [#allocation3], 0  ;;  %s165_s0 = inlined_call_operand.hbm [shape: f32[8,256], index: 0, kind: input, shape index: {}]   ;;  %s166_s1 = inlined_call_operand.vmem [shape: f32[8,2], index: 1, kind: input, shape index: {}]   ;;  %s167_s2 = inlined_call_operand.hbm [shape: f32[8,256], index: 2, kind: output, shape index: {}]  }
   0x1   :  { %8 = vsyncpa [#allocation4], 0  ;;  %s136_s9 = smov [#allocation2]  }
   0x2   :  { %s15_s10 = sshll.u32 %s136_s9, 4  ;;  %s16_s10 = int_to_ptr.vmem [resolvable:$true] %s15_s10 }
   0x3   :  { %s100_s11 = scalar_lea.vmem %s16_s10, 256  ;;  %p105_p1 = scmp.lt.s32.totalorder %s16_s10, %s16_s10 }
   0x4   :  { %p101_p0 = scmp.ne.s32.totalorder %s16_s10, %s100_s11  ;;  %p106_p2 = scmp.lt.s32.totalorder %s100_s11, %s100_s11 }
   0x6   :  { %p107_p3 = por %p106_p2, %p105_p1 }
   0x8   :  { %p108_p4 = pnand %p107_p3, %p101_p0 }
   0xa   :  { %111 = shalt.err (!%p108_p4)
}
   0xb   :  { %18 = dma.hbm_to_vmem [thread:$0]  %s165_s0, 256, %s16_s10, [#allocation3]  }
   0xc   :  { %132 = dma.done.wait [#allocation3], 256  }
   0xd   :  { %133 = vsyncadd [#allocation3], 4294967040  ;;  %v24_v0 = vld [vmem:[#allocation2] sm:$0xff]  ;;  %v25_v1 = vld [vmem:[#allocation2 + $0x8] sm:$0xff]  ;;  %v137_v6 = vmov 0   ;;  %v138_v18 = vmov 1  }
   0xe   :  { %v26_v2 = vadd.f32 %v25_v1, %v24_v0  ;;  %v29_v3 = vmul.f32 %v24_v0, %v24_v0  ;;  %v30_v4 = vmul.f32 %v25_v1, %v25_v1  ;;  %88 = vset.pattern.permute.xlu1 %v137_v6  ;;  %89 = vset.pattern.permute.xlu0 %v138_v18  ;;  %v44_v19 = vld [vmem:[%s166_s1] sm:$0xff]  ;;  %s139_s15 = smov 1   ;;  %s140_s16 = smov [#allocation5]  }
   0xf   :  { %s74_s17 = sshll.u32 %s140_s16, 4  ;;  %s75_s17 = int_to_ptr.vmem [resolvable:$true] %s74_s17 }
  0x10   :  { %27 = vadd.xlane.f32.xlu0 %v26_v2  ;;  %v31_v5 = vadd.f32 %v30_v4, %v29_v3  ;;  %s112_s1 = scalar_lea.vmem %s75_s17, 256  ;;  %p117_p6 = scmp.lt.s32.totalorder %s75_s17, %s75_s17 }
  0x11   :  { %p113_p5 = scmp.ne.s32.totalorder %s75_s17, %s112_s1  ;;  %p118_p7 = scmp.lt.s32.totalorder %s112_s1, %s112_s1 }
  0x13   :  { %p119_p8 = por %p118_p7, %p117_p6 }
  0x14   :  { %32 = vadd.xlane.f32.xlu0 %v31_v5 }
  0x15   :  { %p120_p9 = pnand %p119_p8, %p113_p5 }
  0x99   :  { %v28_v7 = vpop.xlane.xlu0 %27 }
  0x9a   :  { %v34_v8 = vrot.slane %v28_v7, 4 }
  0x9c   :  { %v35_v9 = vadd.f32 %v34_v8, %v28_v7 }
  0x9d   :  { %v33_v10 = vpop.xlane.xlu0 %32 }
  0x9e   :  { %v38_v11 = vmul.f32 0.001953125, %v35_v9  ;;  %v36_v12 = vrot.slane %v33_v10, 4 }
  0xa0   :  { %v37_v13 = vadd.f32 %v36_v12, %v33_v10  ;;  %v40_v14 = vmul.f32 %v38_v11, %v38_v11 }
  0xa2   :  { %v39_v15 = vmul.f32 0.001953125, %v37_v13 }
  0xa4   :  { %v41_v16 = vsub.f32 %v39_v15, %v40_v14 }
  0xa6   :  { %v42_v17 = vadd.f32 1e-05, %v41_v16 }
  0xa8   :  { %90 = vrsqrt.f32 %v42_v17 }
  0xb5   :  { %v91_v20 = vpop.eup %90 }
  0xb6   :  { %v45_v21 = vmul.f32 %v91_v20, %v44_v19 }
  0xb8   :  { %v46_v22 = vmul.f32 %v45_v21, %v38_v11 }
  0xba   :  { %48 = vrot.lane.b32.xlu1 %v46_v22, %s139_s15 }
  0xbe   :  { %54 = vperm.xlu1 %88, %v45_v21  }
 0x12c   :  { %v49_v23 = vpop.permute.xlu1 %48 }
 0x12d   :  { %v51_v24 = vsub.f32 %v44_v19, %v49_v23 }
 0x12f   :  { %61 = vperm.xlu0 %89, %v51_v24  }
 0x139   :  { %v55_v25 = vpop.permute.xlu1 %54 }
 0x13a   :  { %v57_v26 = vmul.f32 %v55_v25, %v24_v0  ;;  %v58_v27 = vmul.f32 %v55_v25, %v25_v1 }
 0x1aa   :  { %v62_v28 = vpop.permute.xlu0 %61 }
 0x1ab   :  { %v64_v29 = vadd.f32 %v62_v28, %v57_v26  ;;  %v65_v30 = vadd.f32 %v62_v28, %v58_v27 }
 0x1ad   :  { %66 = vst [vmem:[#allocation5] sm:$0xff] %v64_v29  ;;  %67 = vst [vmem:[#allocation5 + $0x8] sm:$0xff] %v65_v30 }
 0x1ae   :  { %123 = shalt.err (!%p120_p9)
}
 0x1af   :  { %77 = dma.vmem_to_hbm [thread:$0]  %s75_s17, 256, %s167_s2, [#allocation4]  }
 0x1b0   :  { %134 = dma.done.wait [#allocation4], 256  }
 0x1b1   :  { %135 = vsyncadd [#allocation4], 4294967040 }
 0x1b2   :  { %81 = vsyncpa [#allocation3], 1 }
 0x1b3   :  { %82 = vsyncpa [#allocation4], 1 }

</bundles_post_ra>
